<compile_context>
chip_gen: v6e
topology: v6e:2x2x1
jax: 0.10.0
libtpu: 0.0.40
codegen_flags: <defaults>
</compile_context>

<pallas_src>
import jax
import jax.numpy as jnp
from jax.experimental import pallas as pl
from jax.experimental.pallas import tpu as pltpu


# Packed-slab layout: per layer a 136-row block = 128 weight rows + 8 bias rows.
_K_PAD = 128          # padded contraction dim (lanes of the previous activation)
_N_PAD = 128          # padded output dim (full lane tile)
_BLK = _K_PAD + 8     # rows per layer block (multiple of 8 -> tile-aligned)
_N_LAYERS = 4
_REAL_DIMS = ((16, 64), (64, 32), (32, 32), (32, 5))
_OUT_DIM = 5


def mlp_kernel(x_ref, p_ref, o_ref):
    h = x_ref[...]                                     # [B, 128] lane-dense

    # Four identical [B,128] @ [128,128] MXU matmuls; all parameter slices are
    # full-lane, 8-row-aligned static views of the single packed slab.
    for i in range(_N_LAYERS):
        base = i * _BLK
        w = p_ref[base:base + _K_PAD, :]               # [128, 128]
        b = p_ref[base + _K_PAD:base + _K_PAD + 1, :]  # [1, 128]
        h = jnp.dot(h, w, preferred_element_type=jnp.float32) + b
        if i < _N_LAYERS - 1:
            h = jnp.maximum(h, 0.0)                    # ReLU

    # Softmax over dim 0 (the batch axis), matching nn.Softmax(0).
    # Padded columns hold zero logits; they are sliced off in the wrapper.
    m = jnp.max(h, axis=0, keepdims=True)
    e = jnp.exp(h - m)
    s = jnp.sum(e, axis=0, keepdims=True)
    o_ref[...] = e / s                                 # exact divide (see notes)


def pack_params(params):
    """Pack all (w, b) pairs into one slab [4*136, 128] of f32.

    Layer i occupies rows [136*i, 136*(i+1)):
      rows 0:128  -> weight, zero-padded in both K and N to [128, 128]
      row  128    -> bias, zero-padded to 128 lanes (rows 129:136 are zero)
    """
    blocks = []
    for (w, b) in params:
        k, n = w.shape
        wp = jnp.zeros((_K_PAD, _N_PAD), jnp.float32).at[:k, :n].set(w)
        bp = jnp.zeros((8, _N_PAD), jnp.float32).at[0, :n].set(jnp.reshape(b, (-1,)))
        blocks.append(jnp.concatenate([wp, bp], axis=0))
    return jnp.concatenate(blocks, axis=0)             # [544, 128]


def three_layer_model_forward(x, slab, out_dim=_OUT_DIM):
    B, F = x.shape
    # Lane-dense input: pad features to 128 (layout plumbing, done wrapper-side).
    x_pad = jnp.zeros((B, _K_PAD), jnp.float32).at[:, :F].set(x)

    vmem = pl.BlockSpec(memory_space=pltpu.MemorySpace.VMEM)  # whole array, no pipeline
    real_flops = 2 * B * sum(k * n for (k, n) in _REAL_DIMS)
    cost = pl.CostEstimate(
        flops=real_flops,
        transcendentals=B * out_dim,                   # exp in the softmax
        bytes_accessed=(x_pad.size + slab.size + B * _N_PAD) * 4,
    )

    out_pad = pl.pallas_call(
        mlp_kernel,
        out_shape=jax.ShapeDtypeStruct((B, _N_PAD), jnp.float32),
        in_specs=[vmem, vmem],
        out_specs=vmem,
        cost_estimate=cost,
    )(x_pad, slab)
    return out_pad[:, :out_dim]                        # drop padded columns


def init_linear(key, in_dim, out_dim):
    """Deterministic init mimicking nn.Linear (uniform +-1/sqrt(in))."""
    kw, kb = jax.random.split(key)
    bound = 1.0 / (in_dim ** 0.5)
    # stored as [in, out] (transpose of PyTorch's [out, in] weight)
    w = jax.random.uniform(kw, (in_dim, out_dim), jnp.float32, -bound, bound)
    b = jax.random.uniform(kb, (1, out_dim), jnp.float32, -bound, bound)
    return w, b


def reference_forward(x, params):
    h = x
    for i, (w, b) in enumerate(params):
        h = jnp.dot(h, w, precision=jax.lax.Precision.HIGHEST) + b
        if i < 3:
            h = jnp.maximum(h, 0.0)
    e = jnp.exp(h - jnp.max(h, axis=0, keepdims=True))
    return e / jnp.sum(e, axis=0, keepdims=True)


if __name__ == "__main__":
    key = jax.random.PRNGKey(0)
    k_x, k1, k2, k3, k4 = jax.random.split(key, 5)

    batch = 8
    input_shape = 16

    x = jax.random.normal(k_x, (batch, input_shape), jnp.float32)

    params = (
        init_linear(k1, input_shape, 64),
        init_linear(k2, 64, 32),
        init_linear(k3, 32, 32),
        init_linear(k4, 32, 5),
    )

    slab = pack_params(params)

    out = three_layer_model_forward(x, slab)
    jax.block_until_ready(out)

    # Correctness vs pure-JAX reference (exact divide -> tighter tolerance than before).
    ref = reference_forward(x, params)
    assert out.shape == (batch, _OUT_DIM)
    assert bool(jnp.all(jnp.abs(out - ref) < 1e-3))
    # Softmax over dim 0 -> each column sums to 1 (exact normalization now).
    col_sums = jnp.sum(out, axis=0)
    assert bool(jnp.all(jnp.abs(col_sums - 1.0) < 1e-5))

    print("KERNEL_OK")
</pallas_src>

<mosaic_0001>
module attributes {stable_mosaic.version = 11 : i64} {
  func.func @mlp_kernel(%arg0: memref<8x128xf32, #tpu.memory_space<vmem>>, %arg1: memref<544x128xf32, #tpu.memory_space<vmem>>, %arg2: memref<8x128xf32, #tpu.memory_space<vmem>>) attributes {dimension_semantics = [], scalar_prefetch = 0 : i64, scratch_operands = 0 : i64, tpu.core_type = #tpu.core_type<tc>} {
    %c0 = arith.constant 0 : index
    %c0_0 = arith.constant 0 : index
    %0 = vector.load %arg0[%c0, %c0_0] : memref<8x128xf32, #tpu.memory_space<vmem>>, vector<8x128xf32>
    %c0_1 = arith.constant 0 : index
    %c0_2 = arith.constant 0 : index
    %1 = vector.load %arg1[%c0_1, %c0_2] : memref<544x128xf32, #tpu.memory_space<vmem>>, vector<128x128xf32>
    %c128 = arith.constant 128 : index
    %c0_3 = arith.constant 0 : index
    %2 = vector.load %arg1[%c128, %c0_3] : memref<544x128xf32, #tpu.memory_space<vmem>>, vector<1x128xf32>
    %cst = arith.constant dense<0.000000e+00> : vector<8x128xf32>
    %3 = tpu.matmul %0, %1, %cst {dimension_numbers = #tpu.dot_dimension_numbers<[1], [0], [0], [1], [0, 0, 1, 1], [], []>} : vector<8x128xf32>, vector<128x128xf32>, vector<8x128xf32> -> vector<8x128xf32>
    %4 = vector.broadcast %2 : vector<1x128xf32> to vector<8x128xf32>
    %5 = arith.addf %3, %4 : vector<8x128xf32>
    %cst_4 = arith.constant 0.000000e+00 : f32
    %6 = vector.broadcast %cst_4 : f32 to vector<8x128xf32>
    %7 = arith.maximumf %5, %6 : vector<8x128xf32>
    %c136 = arith.constant 136 : index
    %c0_5 = arith.constant 0 : index
    %8 = vector.load %arg1[%c136, %c0_5] : memref<544x128xf32, #tpu.memory_space<vmem>>, vector<128x128xf32>
    %c264 = arith.constant 264 : index
    %c0_6 = arith.constant 0 : index
    %9 = vector.load %arg1[%c264, %c0_6] : memref<544x128xf32, #tpu.memory_space<vmem>>, vector<1x128xf32>
    %cst_7 = arith.constant dense<0.000000e+00> : vector<8x128xf32>
    %10 = tpu.matmul %7, %8, %cst_7 {dimension_numbers = #tpu.dot_dimension_numbers<[1], [0], [0], [1], [0, 0, 1, 1], [], []>} : vector<8x128xf32>, vector<128x128xf32>, vector<8x128xf32> -> vector<8x128xf32>
    %11 = vector.broadcast %9 : vector<1x128xf32> to vector<8x128xf32>
    %12 = arith.addf %10, %11 : vector<8x128xf32>
    %cst_8 = arith.constant 0.000000e+00 : f32
    %13 = vector.broadcast %cst_8 : f32 to vector<8x128xf32>
    %14 = arith.maximumf %12, %13 : vector<8x128xf32>
    %c272 = arith.constant 272 : index
    %c0_9 = arith.constant 0 : index
    %15 = vector.load %arg1[%c272, %c0_9] : memref<544x128xf32, #tpu.memory_space<vmem>>, vector<128x128xf32>
    %c400 = arith.constant 400 : index
    %c0_10 = arith.constant 0 : index
    %16 = vector.load %arg1[%c400, %c0_10] : memref<544x128xf32, #tpu.memory_space<vmem>>, vector<1x128xf32>
    %cst_11 = arith.constant dense<0.000000e+00> : vector<8x128xf32>
    %17 = tpu.matmul %14, %15, %cst_11 {dimension_numbers = #tpu.dot_dimension_numbers<[1], [0], [0], [1], [0, 0, 1, 1], [], []>} : vector<8x128xf32>, vector<128x128xf32>, vector<8x128xf32> -> vector<8x128xf32>
    %18 = vector.broadcast %16 : vector<1x128xf32> to vector<8x128xf32>
    %19 = arith.addf %17, %18 : vector<8x128xf32>
    %cst_12 = arith.constant 0.000000e+00 : f32
    %20 = vector.broadcast %cst_12 : f32 to vector<8x128xf32>
    %21 = arith.maximumf %19, %20 : vector<8x128xf32>
    %c408 = arith.constant 408 : index
    %c0_13 = arith.constant 0 : index
    %22 = vector.load %arg1[%c408, %c0_13] : memref<544x128xf32, #tpu.memory_space<vmem>>, vector<128x128xf32>
    %c536 = arith.constant 536 : index
    %c0_14 = arith.constant 0 : index
    %23 = vector.load %arg1[%c536, %c0_14] : memref<544x128xf32, #tpu.memory_space<vmem>>, vector<1x128xf32>
    %cst_15 = arith.constant dense<0.000000e+00> : vector<8x128xf32>
    %24 = tpu.matmul %21, %22, %cst_15 {dimension_numbers = #tpu.dot_dimension_numbers<[1], [0], [0], [1], [0, 0, 1, 1], [], []>} : vector<8x128xf32>, vector<128x128xf32>, vector<8x128xf32> -> vector<8x128xf32>
    %25 = vector.broadcast %23 : vector<1x128xf32> to vector<8x128xf32>
    %26 = arith.addf %24, %25 : vector<8x128xf32>
    %cst_16 = arith.constant dense<0xFF800000> : vector<128xf32>
    %27 = vector.multi_reduction <maximumf>, %26, %cst_16 [0] : vector<8x128xf32> to vector<128xf32>
    %28 = vector.shape_cast %27 : vector<128xf32> to vector<1x128xf32>
    %29 = vector.broadcast %28 : vector<1x128xf32> to vector<8x128xf32>
    %30 = arith.subf %26, %29 : vector<8x128xf32>
    %31 = math.exp %30 : vector<8x128xf32>
    %cst_17 = arith.constant dense<0.000000e+00> : vector<128xf32>
    %32 = vector.multi_reduction <add>, %31, %cst_17 [0] : vector<8x128xf32> to vector<128xf32>
    %33 = vector.shape_cast %32 : vector<128xf32> to vector<1x128xf32>
    %34 = vector.broadcast %33 : vector<1x128xf32> to vector<8x128xf32>
    %35 = arith.divf %31, %34 : vector<8x128xf32>
    %c0_18 = arith.constant 0 : index
    %c0_19 = arith.constant 0 : index
    %36 = vector.load %arg2[%c0_18, %c0_19] : memref<8x128xf32, #tpu.memory_space<vmem>>, vector<8x128xf32>
    tpu.vector_store %arg2[%c0_18, %c0_19], %35 {strides = array<i32>} : memref<8x128xf32, #tpu.memory_space<vmem>>, vector<8x128xf32>,
    return
  }
}

</mosaic_0001>

<bundles_post_ra>
// kernel: tpu_custom_call.1
= control target key start
LH: loop header
LB: loop body
LE: loop exit
PB: predicated region body
PF: predicated region fallthrough
CT: control target
= control target key end

     0   :  { %7 = vsyncpa [#allocation3], 0  ;;  %s832_s0 = inlined_call_operand.hbm [shape: f32[8,128], index: 0, kind: input, shape index: {}]   ;;  %s833_s1 = inlined_call_operand.hbm [shape: f32[544,128], index: 1, kind: input, shape index: {}]   ;;  %s834_s2 = inlined_call_operand.hbm [shape: f32[8,128], index: 2, kind: output, shape index: {}]  }
   0x1   :  { %8 = vsyncpa [#allocation6], 0 }
   0x2   :  { %9 = vsyncpa [#allocation4], 0  ;;  %s729_s9 = smov [#allocation2]   ;;  %s730_s11 = smov [#allocation5]  }
   0x3   :  { %s16_s10 = sshll.u32 %s729_s9, 4  ;;  %s25_s12 = sshll.u32 %s730_s11, 4  ;;  %s17_s10 = int_to_ptr.vmem [resolvable:$true] %s16_s10  ;;  %s26_s12 = int_to_ptr.vmem [resolvable:$true] %s25_s12 }
   0x4   :  { %s671_s13 = scalar_lea.vmem %s17_s10, 128  ;;  %p676_p1 = scmp.lt.s32.totalorder %s17_s10, %s17_s10 }
   0x5   :  { %p672_p0 = scmp.ne.s32.totalorder %s17_s10, %s671_s13  ;;  %p677_p2 = scmp.lt.s32.totalorder %s671_s13, %s671_s13 }
   0x7   :  { %p678_p3 = por %p677_p2, %p676_p1 }
   0x9   :  { %p679_p4 = pnand %p678_p3, %p672_p0 }
   0xb   :  { %682 = shalt.err (!%p679_p4)
}
   0xc   :  { %19 = dma.hbm_to_vmem [thread:$0]  %s832_s0, 128, %s17_s10, [#allocation3]  }
   0xd   :  { %s691_s16 = scalar_lea.vmem %s26_s12, 8704  ;;  %p696_p6 = scmp.lt.s32.totalorder %s26_s12, %s26_s12 }
   0xe   :  { %p692_p5 = scmp.ne.s32.totalorder %s26_s12, %s691_s16  ;;  %p697_p7 = scmp.lt.s32.totalorder %s691_s16, %s691_s16 }
  0x10   :  { %p698_p8 = por %p697_p7, %p696_p6 }
  0x12   :  { %p699_p9 = pnand %p698_p8, %p692_p5 }
  0x14   :  { %702 = shalt.err (!%p699_p9)
}
  0x15   :  { %s731_s17 = smov 128   ;;  %s732_s18 = smov 8  }
  0x16   :  { %31 = dma.hbm_to_vmem [thread:$0]  %s833_s1, 8704, %s26_s12, [#allocation6], %s731_s17, %s731_s17, %s732_s18  }
  0x17   :  { %723 = dma.done.wait [#allocation3], 128  }
  0x18   :  { %724 = vsyncadd [#allocation3], 4294967168 }
  0x19   :  { %725 = dma.done.wait [#allocation6], 8704  }
  0x1a   :  { %726 = vsyncadd [#allocation6], 4294958592  ;;  %v733_v0 = vmov 0.0   ;;  %vm734_vm0 = vmmov 0   ;;  %v54_v1 = vld [vmem:[#allocation5 + $0x78] sm:$0xff]  ;;  %v53_v2 = vld [vmem:[#allocation5 + $0x70] sm:$0xff] }
  0x1b   :  { %512 = vmatprep.subr.mxu0 %v733_v0  ;;  %544 = vmatprep.mubr.msk.f32.mxu0 %vm734_vm0, %v733_v0  ;;  %v52_v3 = vld [vmem:[#allocation5 + $0x68] sm:$0xff]  ;;  %v51_v4 = vld [vmem:[#allocation5 + $0x60] sm:$0xff]  ;;  %v50_v6 = vld [vmem:[#allocation5 + $0x58] sm:$0xff]  ;;  %s735_s0 = smov [#allocation7]  }
  0x1c   :  { %547 = vmatprep.subr.mxu1 %v733_v0  ;;  %579 = vmatprep.mubr.msk.f32.mxu1 %vm734_vm0, %v733_v0  ;;  %v146_v5 = vld [vmem:[#allocation5 + $0x100] sm:$0xff]  ;;  %v145_v7 = vld [vmem:[#allocation5 + $0xf8] sm:$0xff]  ;;  %v144_v8 = vld [vmem:[#allocation5 + $0xf0] sm:$0xff]  ;;  %s430_s1 = sshll.u32 %s735_s0, 4  ;;  %s431_s1 = int_to_ptr.vmem [resolvable:$true] %s430_s1 }
  0x1d   :  { %513 = vmatpush3.msra.mxu0 %v54_v1  ;;  %548 = vmatpush3.msra.mxu1 %v146_v5  ;;  %v49_v9 = vld [vmem:[#allocation5 + $0x50] sm:$0xff]  ;;  %v143_v10 = vld [vmem:[#allocation5 + $0xe8] sm:$0xff]  ;;  %v142_v12 = vld [vmem:[#allocation5 + $0xe0] sm:$0xff]  ;;  %s703_s21 = scalar_lea.vmem %s431_s1, 128  ;;  %p708_p11 = scmp.lt.s32.totalorder %s431_s1, %s431_s1 }
  0x1e   :  { %514 = vmatprep.subr.mxu0 %v733_v0  ;;  %549 = vmatprep.subr.mxu1 %v733_v0  ;;  %v48_v11 = vld [vmem:[#allocation5 + $0x48] sm:$0xff]  ;;  %v47_v13 = vld [vmem:[#allocation5 + $0x40] sm:$0xff]  ;;  %v141_v14 = vld [vmem:[#allocation5 + $0xd8] sm:$0xff]  ;;  %p704_p10 = scmp.ne.s32.totalorder %s431_s1, %s703_s21  ;;  %p709_p12 = scmp.lt.s32.totalorder %s703_s21, %s703_s21 }
  0x1f   :  { %515 = vmatpush3.msra.mxu0 %v53_v2  ;;  %550 = vmatpush3.msra.mxu1 %v145_v7  ;;  %v46_v15 = vld [vmem:[#allocation5 + $0x38] sm:$0xff]  ;;  %v140_v16 = vld [vmem:[#allocation5 + $0xd0] sm:$0xff]  ;;  %v139_v18 = vld [vmem:[#allocation5 + $0xc8] sm:$0xff] }
  0x20   :  { %516 = vmatprep.subr.mxu0 %v733_v0  ;;  %551 = vmatprep.subr.mxu1 %v733_v0  ;;  %v45_v17 = vld [vmem:[#allocation5 + $0x30] sm:$0xff]  ;;  %v44_v19 = vld [vmem:[#allocation5 + $0x28] sm:$0xff]  ;;  %v138_v20 = vld [vmem:[#allocation5 + $0xc0] sm:$0xff]  ;;  %p710_p13 = por %p709_p12, %p708_p11 }
  0x21   :  { %517 = vmatpush3.msra.mxu0 %v52_v3  ;;  %552 = vmatpush3.msra.mxu1 %v144_v8  ;;  %v43_v21 = vld [vmem:[#allocation5 + $0x20] sm:$0xff]  ;;  %v137_v22 = vld [vmem:[#allocation5 + $0xb8] sm:$0xff]  ;;  %v136_v24 = vld [vmem:[#allocation5 + $0xb0] sm:$0xff] }
  0x22   :  { %518 = vmatprep.subr.mxu0 %v733_v0  ;;  %553 = vmatprep.subr.mxu1 %v733_v0  ;;  %v42_v23 = vld [vmem:[#allocation5 + $0x18] sm:$0xff]  ;;  %v41_v25 = vld [vmem:[#allocation5 + $0x10] sm:$0xff]  ;;  %v135_v26 = vld [vmem:[#allocation5 + $0xa8] sm:$0xff]  ;;  %p711_p0 = pnand %p710_p13, %p704_p10 }
  0x23   :  { %519 = vmatpush3.msra.mxu0 %v51_v4  ;;  %554 = vmatpush3.msra.mxu1 %v143_v10  ;;  %v40_v27 = vld [vmem:[#allocation5 + $0x8] sm:$0xff]  ;;  %v134_v28 = vld [vmem:[#allocation5 + $0xa0] sm:$0xff]  ;;  %v38_v30 = vld [vmem:[#allocation2] sm:$0xff] }
  0x24   :  { %520 = vmatprep.subr.mxu0 %v733_v0  ;;  %555 = vmatprep.subr.mxu1 %v733_v0  ;;  %v39_v29 = vld [vmem:[#allocation5] sm:$0xff]  ;;  %v133_v31 = vld [vmem:[#allocation5 + $0x98] sm:$0xff]  ;;  %v132_v32 = vld [vmem:[#allocation5 + $0x90] sm:$0xff] }
  0x25   :  { %521 = vmatpush3.msra.mxu0 %v50_v6  ;;  %556 = vmatpush3.msra.mxu1 %v142_v12  ;;  %v131_v33 = vld [vmem:[#allocation5 + $0x88] sm:$0xff]  ;;  %v237_v35 = vld [vmem:[#allocation5 + $0x180] sm:$0xff]  ;;  %v236_v36 = vld [vmem:[#allocation5 + $0x178] sm:$0xff] }
  0x26   :  { %522 = vmatprep.subr.mxu0 %v733_v0  ;;  %557 = vmatprep.subr.mxu1 %v733_v0  ;;  %v238_v34 = vld [vmem:[#allocation5 + $0x188] sm:$0xff]  ;;  %v235_v37 = vld [vmem:[#allocation5 + $0x170] sm:$0xff]  ;;  %v233_v39 = vld [vmem:[#allocation5 + $0x160] sm:$0xff] }
  0x27   :  { %523 = vmatpush3.msra.mxu0 %v49_v9  ;;  %558 = vmatpush3.msra.mxu1 %v141_v14  ;;  %v234_v38 = vld [vmem:[#allocation5 + $0x168] sm:$0xff]  ;;  %v232_v40 = vld [vmem:[#allocation5 + $0x158] sm:$0xff]  ;;  %v231_v41 = vld [vmem:[#allocation5 + $0x150] sm:$0xff] }
  0x28   :  { %524 = vmatprep.subr.mxu0 %v733_v0  ;;  %559 = vmatprep.subr.mxu1 %v733_v0  ;;  %v230_v42 = vld [vmem:[#allocation5 + $0x148] sm:$0xff]  ;;  %v229_v43 = vld [vmem:[#allocation5 + $0x140] sm:$0xff]  ;;  %v228_v44 = vld [vmem:[#allocation5 + $0x138] sm:$0xff] }
  0x29   :  { %525 = vmatpush3.msra.mxu0 %v48_v11  ;;  %560 = vmatpush3.msra.mxu1 %v140_v16  ;;  %v227_v45 = vld [vmem:[#allocation5 + $0x130] sm:$0xff]  ;;  %v226_v46 = vld [vmem:[#allocation5 + $0x128] sm:$0xff]  ;;  %v440_v47 = vld [vmem:[#allocation5 + $0x80] ss:$0 sm:$0xff] }
  0x2a   :  { %526 = vmatprep.subr.mxu0 %v733_v0  ;;  %561 = vmatprep.subr.mxu1 %v733_v0  ;;  %v225_v52 = vld [vmem:[#allocation5 + $0x120] sm:$0xff]  ;;  %v224_v53 = vld [vmem:[#allocation5 + $0x118] sm:$0xff]  ;;  %v223_v54 = vld [vmem:[#allocation5 + $0x110] sm:$0xff] }
  0x2b   :  { %527 = vmatpush3.msra.mxu0 %v47_v13  ;;  %562 = vmatpush3.msra.mxu1 %v139_v18  ;;  %v330_v55 = vld [vmem:[#allocation5 + $0x210] sm:$0xff]  ;;  %v329_v56 = vld [vmem:[#allocation5 + $0x208] sm:$0xff]  ;;  %v328_v57 = vld [vmem:[#allocation5 + $0x200] sm:$0xff] }
  0x2c   :  { %528 = vmatprep.subr.mxu0 %v733_v0  ;;  %563 = vmatprep.subr.mxu1 %v733_v0  ;;  %v327_v58 = vld [vmem:[#allocation5 + $0x1f8] sm:$0xff]  ;;  %v326_v59 = vld [vmem:[#allocation5 + $0x1f0] sm:$0xff]  ;;  %v325_v60 = vld [vmem:[#allocation5 + $0x1e8] sm:$0xff] }
  0x2d   :  { %529 = vmatpush3.msra.mxu0 %v46_v15  ;;  %564 = vmatpush3.msra.mxu1 %v138_v20  ;;  %v324_v61 = vld [vmem:[#allocation5 + $0x1e0] sm:$0xff]  ;;  %v323_v62 = vld [vmem:[#allocation5 + $0x1d8] sm:$0xff]  ;;  %v322_v63 = vld [vmem:[#allocation5 + $0x1d0] sm:$0xff] }
  0x2e   :  { %530 = vmatprep.subr.mxu0 %v733_v0  ;;  %565 = vmatprep.subr.mxu1 %v733_v0  ;;  %v321_v1 = vld [vmem:[#allocation5 + $0x1c8] sm:$0xff]  ;;  %v320_v2 = vld [vmem:[#allocation5 + $0x1c0] sm:$0xff]  ;;  %v319_v3 = vld [vmem:[#allocation5 + $0x1b8] sm:$0xff] }
  0x2f   :  { %531 = vmatpush3.msra.mxu0 %v45_v17  ;;  %566 = vmatpush3.msra.mxu1 %v137_v22  ;;  %v318_v4 = vld [vmem:[#allocation5 + $0x1b0] sm:$0xff]  ;;  %v441_v5 = vld [vmem:[#allocation5 + $0x108] ss:$0 sm:$0xff]  ;;  %v316_v11 = vld [vmem:[#allocation5 + $0x1a0] sm:$0xff] }
  0x30   :  { %532 = vmatprep.subr.mxu0 %v733_v0  ;;  %567 = vmatprep.subr.mxu1 %v733_v0  ;;  %v317_v10 = vld [vmem:[#allocation5 + $0x1a8] sm:$0xff]  ;;  %v315_v12 = vld [vmem:[#allocation5 + $0x198] sm:$0xff]  ;;  %v442_v13 = vld [vmem:[#allocation5 + $0x190] ss:$0 sm:$0xff] }
  0x31   :  { %533 = vmatpush3.msra.mxu0 %v44_v19  ;;  %568 = vmatpush3.msra.mxu1 %v136_v24  ;;  %v443_v18 = vld [vmem:[#allocation5 + $0x218] ss:$0 sm:$0xff] }
  0x32   :  { %534 = vmatprep.subr.mxu0 %v733_v0  ;;  %569 = vmatprep.subr.mxu1 %v733_v0 }
  0x33   :  { %535 = vmatpush3.msra.mxu0 %v43_v21  ;;  %570 = vmatpush3.msra.mxu1 %v135_v26 }
  0x34   :  { %536 = vmatprep.subr.mxu0 %v733_v0  ;;  %571 = vmatprep.subr.mxu1 %v733_v0 }
  0x35   :  { %537 = vmatpush3.msra.mxu0 %v42_v23  ;;  %572 = vmatpush3.msra.mxu1 %v134_v28 }
  0x36   :  { %538 = vmatprep.subr.mxu0 %v733_v0  ;;  %573 = vmatprep.subr.mxu1 %v733_v0 }
  0x37   :  { %539 = vmatpush3.msra.mxu0 %v41_v25  ;;  %574 = vmatpush3.msra.mxu1 %v133_v31 }
  0x38   :  { %540 = vmatprep.subr.mxu0 %v733_v0  ;;  %575 = vmatprep.subr.mxu1 %v733_v0 }
  0x39   :  { %541 = vmatpush3.msra.mxu0 %v40_v27  ;;  %576 = vmatpush3.msra.mxu1 %v132_v32 }
  0x3a   :  { %542 = vmatprep.subr.mxu0 %v733_v0  ;;  %577 = vmatprep.subr.mxu1 %v733_v0 }
  0x3b   :  { %543 = vmatpush3.msra.mxu0 %v39_v29  ;;  %578 = vmatpush3.msra.mxu1 %v131_v33 }
  0x3c   :  { %545 = vmatmul.mubr.f32.vlgmr.msra.gmra.mxu0 %v38_v30  ;;  %582 = vmatprep.subr.mxu0 %v733_v0 }
  0x3d   :  { %614 = vmatprep.mubr.msk.f32.mxu0 %vm734_vm0, %v733_v0  ;;  %617 = vmatprep.subr.mxu1 %v733_v0 }
  0x3e   :  { %583 = vmatpush3.msra.mxu0 %v238_v34 }
  0x3f   :  { %584 = vmatprep.subr.mxu0 %v733_v0 }
  0x40   :  { %585 = vmatpush3.msra.mxu0 %v237_v35 }
  0x41   :  { %586 = vmatprep.subr.mxu0 %v733_v0 }
  0x42   :  { %587 = vmatpush3.msra.mxu0 %v236_v36 }
  0x43   :  { %588 = vmatprep.subr.mxu0 %v733_v0 }
  0x44   :  { %589 = vmatpush3.msra.mxu0 %v235_v37 }
  0x45   :  { %590 = vmatprep.subr.mxu0 %v733_v0 }
  0x46   :  { %591 = vmatpush3.msra.mxu0 %v234_v38 }
  0x47   :  { %592 = vmatprep.subr.mxu0 %v733_v0 }
  0x48   :  { %593 = vmatpush3.msra.mxu0 %v233_v39 }
  0x49   :  { %594 = vmatprep.subr.mxu0 %v733_v0 }
  0x4a   :  { %595 = vmatpush3.msra.mxu0 %v232_v40 }
  0x4b   :  { %596 = vmatprep.subr.mxu0 %v733_v0 }
  0x4c   :  { %597 = vmatpush3.msra.mxu0 %v231_v41 }
  0x4d   :  { %598 = vmatprep.subr.mxu0 %v733_v0 }
  0x4e   :  { %599 = vmatpush3.msra.mxu0 %v230_v42 }
  0x4f   :  { %600 = vmatprep.subr.mxu0 %v733_v0 }
  0x50   :  { %601 = vmatpush3.msra.mxu0 %v229_v43 }
  0x51   :  { %602 = vmatprep.subr.mxu0 %v733_v0 }
  0x52   :  { %603 = vmatpush3.msra.mxu0 %v228_v44 }
  0x53   :  { %604 = vmatprep.subr.mxu0 %v733_v0 }
  0x54   :  { %605 = vmatpush3.msra.mxu0 %v227_v45 }
  0x55   :  { %606 = vmatprep.subr.mxu0 %v733_v0 }
  0x56   :  { %607 = vmatpush3.msra.mxu0 %v226_v46 }
  0x57   :  { %608 = vmatprep.subr.mxu0 %v733_v0 }
  0x58   :  { %609 = vmatpush3.msra.mxu0 %v225_v52 }
  0x59   :  { %610 = vmatprep.subr.mxu0 %v733_v0 }
  0x5a   :  { %611 = vmatpush3.msra.mxu0 %v224_v53 }
  0x5b   :  { %612 = vmatprep.subr.mxu0 %v733_v0 }
  0x5c   :  { %613 = vmatpush3.msra.mxu0 %v223_v54 }
  0xfc   :  { %v126_v48 = vpop.f32.mrf.mxu0 }
  0xfd   :  { %v127_v49 = vadd.f32 %v440_v47, %v126_v48 }
  0xfe   :  { %v546_v50 = vpop.f32.mrf.mxu0 }
  0xff   :  { %v130_v51 = vmax.f32 %v127_v49, 0.0 }
 0x101   :  { %580 = vmatmul.mubr.f32.vlgmr.msra.gmra.mxu1 %v130_v51 }
 0x102   :  { %649 = vmatprep.mubr.msk.f32.mxu1 %vm734_vm0, %v733_v0  ;;  %618 = vmatpush3.msra.mxu1 %v330_v55 }
 0x103   :  { %619 = vmatprep.subr.mxu1 %v733_v0 }
 0x104   :  { %620 = vmatpush3.msra.mxu1 %v329_v56 }
 0x105   :  { %621 = vmatprep.subr.mxu1 %v733_v0 }
 0x106   :  { %622 = vmatpush3.msra.mxu1 %v328_v57 }
 0x107   :  { %623 = vmatprep.subr.mxu1 %v733_v0 }
 0x108   :  { %624 = vmatpush3.msra.mxu1 %v327_v58 }
 0x109   :  { %625 = vmatprep.subr.mxu1 %v733_v0 }
 0x10a   :  { %626 = vmatpush3.msra.mxu1 %v326_v59 }
 0x10b   :  { %627 = vmatprep.subr.mxu1 %v733_v0 }
 0x10c   :  { %628 = vmatpush3.msra.mxu1 %v325_v60 }
 0x10d   :  { %629 = vmatprep.subr.mxu1 %v733_v0 }
 0x10e   :  { %630 = vmatpush3.msra.mxu1 %v324_v61 }
 0x10f   :  { %631 = vmatprep.subr.mxu1 %v733_v0 }
 0x110   :  { %632 = vmatpush3.msra.mxu1 %v323_v62 }
 0x111   :  { %633 = vmatprep.subr.mxu1 %v733_v0 }
 0x112   :  { %634 = vmatpush3.msra.mxu1 %v322_v63 }
 0x113   :  { %635 = vmatprep.subr.mxu1 %v733_v0 }
 0x114   :  { %636 = vmatpush3.msra.mxu1 %v321_v1 }
 0x115   :  { %637 = vmatprep.subr.mxu1 %v733_v0 }
 0x116   :  { %638 = vmatpush3.msra.mxu1 %v320_v2 }
 0x117   :  { %639 = vmatprep.subr.mxu1 %v733_v0 }
 0x118   :  { %640 = vmatpush3.msra.mxu1 %v319_v3 }
 0x119   :  { %641 = vmatprep.subr.mxu1 %v733_v0 }
 0x11a   :  { %642 = vmatpush3.msra.mxu1 %v318_v4 }
 0x11b   :  { %643 = vmatprep.subr.mxu1 %v733_v0 }
 0x11c   :  { %644 = vmatpush3.msra.mxu1 %v317_v10 }
 0x11d   :  { %645 = vmatprep.subr.mxu1 %v733_v0 }
 0x11e   :  { %646 = vmatpush3.msra.mxu1 %v316_v11 }
 0x11f   :  { %647 = vmatprep.subr.mxu1 %v733_v0 }
 0x120   :  { %648 = vmatpush3.msra.mxu1 %v315_v12 }
 0x1c1   :  { %v218_v6 = vpop.f32.mrf.mxu1 }
 0x1c2   :  { %v219_v7 = vadd.f32 %v441_v5, %v218_v6 }
 0x1c3   :  { %v581_v8 = vpop.f32.mrf.mxu1 }
 0x1c4   :  { %v222_v9 = vmax.f32 %v219_v7, 0.0 }
 0x1c6   :  { %615 = vmatmul.mubr.f32.vlgmr.msra.gmra.mxu0 %v222_v9 }
 0x286   :  { %v310_v14 = vpop.f32.mrf.mxu0 }
 0x287   :  { %v311_v15 = vadd.f32 %v442_v13, %v310_v14 }
 0x288   :  { %v616_v16 = vpop.f32.mrf.mxu0 }
 0x289   :  { %v314_v17 = vmax.f32 %v311_v15, 0.0 }
 0x28b   :  { %650 = vmatmul.mubr.f32.vlgmr.msra.gmra.mxu1 %v314_v17 }
 0x34b   :  { %v402_v19 = vpop.f32.mrf.mxu1 }
 0x34c   :  { %v403_v20 = vadd.f32 %v443_v18, %v402_v19 }
 0x34d   :  { %v651_v21 = vpop.f32.mrf.mxu1 }
 0x34e   :  { %v406_v22 = vrot.slane %v403_v20, 4 }
 0x350   :  { %v407_v23 = vmax.f32 %v403_v20, %v406_v22 }
 0x352   :  { %v408_v24 = vrot.slane %v407_v23, 2 }
 0x354   :  { %v409_v25 = vmax.f32 %v407_v23, %v408_v24 }
 0x356   :  { %v410_v26 = vrot.slane %v409_v25, 1 }
 0x358   :  { %v411_v27 = vmax.f32 %v409_v25, %v410_v26 }
 0x35a   :  { %v412_v28 = vsub.f32 %v403_v20, %v411_v27 }
 0x35c   :  { %v413_v0 = vmul.f32 1.442695, %v412_v28 }
 0x35e   :  { %659 = vpow2.f32 %v413_v0 }
 0x36b   :  { %v660_v29 = vpop.eup %659 }
 0x36c   :  { %v415_v30 = vrot.slane %v660_v29, 4 }
 0x36e   :  { %v416_v31 = vadd.f32 %v660_v29, %v415_v30 }
 0x370   :  { %v417_v32 = vrot.slane %v416_v31, 2 }
 0x372   :  { %v418_v33 = vadd.f32 %v417_v32, %v416_v31 }
 0x374   :  { %v419_v34 = vrot.slane %v418_v33, 1 }
 0x376   :  { %v420_v35 = vadd.f32 %v419_v34, %v418_v33 }
 0x378   :  { %661 = vrcp.f32 %v420_v35 }
 0x385   :  { %v662_v36 = vpop.eup %661 }
 0x386   :  { %v422_v37 = vmul.f32 %v662_v36, %v660_v29 }
 0x388   :  { %423 = vst [vmem:[#allocation7] sm:$0xff] %v422_v37 }
 0x389   :  { %714 = shalt.err (!%p711_p0)
}
 0x38a   :  { %433 = dma.vmem_to_hbm [thread:$0]  %s431_s1, 128, %s834_s2, [#allocation4]  }
 0x38b   :  { %727 = dma.done.wait [#allocation4], 128  }
 0x38c   :  { %728 = vsyncadd [#allocation4], 4294967168 }
 0x38d   :  { %437 = vsyncpa [#allocation3], 1 }
 0x38e   :  { %438 = vsyncpa [#allocation6], 1 }
 0x38f   :  { %439 = vsyncpa [#allocation4], 1 }

</bundles_post_ra>
